<compile_context>
chip_gen: v6e
topology: v6e:2x2x1
jax: 0.10.0
libtpu: 0.0.40
codegen_flags: <defaults>
</compile_context>

<pallas_src>
import jax
import jax.numpy as jnp
from jax.experimental import pallas as pl
from jax.experimental.pallas import tpu as pltpu

# ---------------- config ----------------
TAG_SIZE = 8
NUM_PRE_PREDS = 2
NUM_PRE_TOKENS = 2
NUM_NXT_TOKENS = 2
IN_HIDDEN = 32
HIDDEN = 32
EMB = 16
BATCH = 2
SEQ = 8
IGNORE_INDEX = -1

IN_FEAT = (NUM_PRE_PREDS * EMB + NUM_PRE_TOKENS * IN_HIDDEN
           + IN_HIDDEN + NUM_NXT_TOKENS * IN_HIDDEN)          # 192
WIDE = 4 * HIDDEN                                             # 128 lanes = [hy|hf|hc|hl]
OUT_PAD = 128                                                 # lane-dense output width


# ---------------- Pallas kernel: whole forward in one fused step ----------------
def enhanced_cell_kernel(x_ref, w_in_ref, w_z_ref, w_att_ref, w_out_ref, b_ref, out_ref):
    """Fused EnhancedCell forward over all S*B rows.

    x_ref    : (M, 192)  f32   rows = [pred_e | f_prev | f_cur | f_nxt]
    w_in_ref : (192,128)  bf16  block-diag(w_hy, w_hf, w_hc, w_hl)
    w_z_ref  : (128,128)  bf16  fused decay gates (hy/hc row-blocks, zero hf/hl rows)
    w_att_ref: (128,128)  bf16  attention weights, gate logit replicated per 32 lanes
    w_out_ref: (128,128)  bf16  4x row-tiled, lane-padded output projection
    b_ref    : (4, 128)   f32   rows = [b_in, b_z, b_att_wide, b_out_pad]
    out_ref  : (M, 128)   f32   lanes [:TAG_SIZE] hold the logits
    """
    b = b_ref[...]
    x = x_ref[...].astype(jnp.bfloat16)

    # Fused input projections + ReLU -> lane-dense [hy | hf | hc | hl].
    h = jnp.dot(x, w_in_ref[...], preferred_element_type=jnp.float32) + b[0:1, :]
    h = jnp.maximum(h, 0.0)
    hb = h.astype(jnp.bfloat16)

    # Fused decay gates: one matmul, one sigmoid pass over the (M, 128) slab.
    z = jax.nn.sigmoid(
        jnp.dot(hb, w_z_ref[...], preferred_element_type=jnp.float32) + b[1:2, :])

    # Attention: each gate's logit is replicated across its 32-lane block,
    # so the softmax can be computed directly on the wide slab.
    a_logit = jnp.dot(hb, w_att_ref[...], preferred_element_type=jnp.float32) + b[2:3, :]
    a_logit = a_logit - jnp.max(a_logit, axis=-1, keepdims=True)
    a_exp = jnp.exp(a_logit)
    denom = jnp.sum(a_exp, axis=-1, keepdims=True) * (1.0 / HIDDEN)  # H copies per gate
    att = a_exp * pl.reciprocal(denom, approx=True)

    # Gate reduction folded into the row-tiled output projection:
    #   out = sum_g (h_g * z_g * att_g) @ w_out == (h * z * att) @ tile(w_out, 4).
    gated = (h * z * att).astype(jnp.bfloat16)
    out_ref[...] = (jnp.dot(gated, w_out_ref[...], preferred_element_type=jnp.float32)
                    + b[3:4, :]).astype(out_ref.dtype)


# ---------------- glue: padding / embedding / window packing ----------------
def padding_feats(feats, lengths, pad_bng, pad_end):
    B, S, D = feats.shape
    total = NUM_PRE_TOKENS + S + NUM_NXT_TOKENS
    pos = jnp.arange(total)
    rows = []
    for b in range(B):
        L = lengths[b]
        is_bng = pos < NUM_PRE_TOKENS
        is_feat = (pos >= NUM_PRE_TOKENS) & (pos < NUM_PRE_TOKENS + L)
        feat_idx = jnp.clip(pos - NUM_PRE_TOKENS, 0, S - 1)
        gathered = feats[b][feat_idx]                         # (total, D)
        row = jnp.where(is_bng[:, None], pad_bng[0, 0],
                        jnp.where(is_feat[:, None], gathered, pad_end[0, 0]))
        rows.append(row)
    return jnp.stack(rows, axis=0)                            # (B, total, D)


def build_true_embs(labels, emb_table):
    B, S = labels.shape
    bng = jnp.arange(-NUM_PRE_PREDS, 0, dtype=jnp.int32)
    ids = jnp.concatenate([jnp.broadcast_to(bng, (B, NUM_PRE_PREDS)), labels], axis=1)
    ids = jnp.where(ids < 0, ids + TAG_SIZE + NUM_PRE_PREDS, ids)   # tag_id_mod
    return emb_table[ids]                                     # (B, NPP+S, EMB)


def build_window_slab(true_embs, feats_pad, B, S):
    pred_e = jnp.stack(
        [true_embs[:, s:s + NUM_PRE_PREDS, :].reshape(B, -1) for s in range(S)], axis=0)
    f_prev = jnp.stack(
        [feats_pad[:, s:s + NUM_PRE_TOKENS, :].reshape(B, -1) for s in range(S)], axis=0)
    f_cur = jnp.transpose(feats_pad[:, NUM_PRE_TOKENS:NUM_PRE_TOKENS + S, :], (1, 0, 2))
    f_nxt = jnp.stack(
        [feats_pad[:, s + NUM_PRE_TOKENS + 1:s + NUM_PRE_TOKENS + 1 + NUM_NXT_TOKENS, :]
         .reshape(B, -1) for s in range(S)], axis=0)
    x = jnp.concatenate([pred_e, f_prev, f_cur, f_nxt], axis=-1)   # (S, B, 192)
    return x.reshape(S * B, IN_FEAT)


def pack_weights(p):
    """Trace-time packing into the fused, lane-dense kernel operands."""
    H = HIDDEN
    f32 = jnp.float32

    # Block-diagonal fused input projection (row blocks follow the x concat order).
    w_in = jnp.zeros((IN_FEAT, WIDE), f32)
    w_in = w_in.at[0:32, 0:H].set(p['w_hy'])
    w_in = w_in.at[32:96, H:2 * H].set(p['w_hf'])
    w_in = w_in.at[96:128, 2 * H:3 * H].set(p['w_hc'])
    w_in = w_in.at[128:192, 3 * H:4 * H].set(p['w_hl'])
    b_in = jnp.concatenate([p['b_hy'], p['b_hf'], p['b_hc'], p['b_hl']], axis=-1)  # (1,128)

    # Fused decay gates: gate g (order [Z_hy, Z_hf, Z_hc, Z_hl]) reads the hy / hc
    # blocks of h; hf / hl rows stay zero.
    w_z = jnp.zeros((WIDE, WIDE), f32)
    for g in range(4):
        w_z = w_z.at[0:H, g * H:(g + 1) * H].set(p['wz_y'][g])
        w_z = w_z.at[2 * H:3 * H, g * H:(g + 1) * H].set(p['wz_c'][g])
    b_z = jnp.concatenate([p['bz'][g] for g in range(4)], axis=-1)                 # (1,128)

    # Attention, widened so gate g's logit fills lanes [g*H, (g+1)*H).
    wa_full = jnp.zeros((WIDE, 4), f32)
    wa_full = wa_full.at[0:H, :].set(p['wa_y'])
    wa_full = wa_full.at[2 * H:3 * H, :].set(p['wa_c'])
    expand = (jnp.arange(WIDE)[None, :] // H == jnp.arange(4)[:, None]).astype(f32)  # (4,128)
    w_att = wa_full @ expand                                                       # (128,128)
    b_att = p['b_a'] @ expand                                                      # (1,128)

    # 4x row-tiled, lane-padded output projection (folds the gate-sum reduction).
    w_out_p = jnp.zeros((H, OUT_PAD), f32).at[:, :TAG_SIZE].set(p['w_out'])
    w_out = jnp.tile(w_out_p, (4, 1))                                              # (128,128)
    b_out = jnp.zeros((1, OUT_PAD), f32).at[:, :TAG_SIZE].set(p['b_out'])

    biases = jnp.concatenate([b_in, b_z, b_att, b_out], axis=0)                    # (4,128)

    bf16 = jnp.bfloat16
    return (w_in.astype(bf16), w_z.astype(bf16), w_att.astype(bf16),
            w_out.astype(bf16), biases)


def enhanced_cell_probs_pallas(feats, lengths, labels, p):
    B, S, D = feats.shape
    true_embs = build_true_embs(labels, p['emb'])
    feats_pad = padding_feats(feats, lengths, p['pad_bng'], p['pad_end'])
    x = build_window_slab(true_embs, feats_pad, B, S)                 # (S*B, 192)
    w_in, w_z, w_att, w_out, biases = pack_weights(p)

    M = S * B
    spec2 = lambda shape: pl.BlockSpec(shape, lambda i: (0, 0))       # full-array blocks

    out_wide = pl.pallas_call(
        enhanced_cell_kernel,
        out_shape=jax.ShapeDtypeStruct((M, OUT_PAD), jnp.float32),
        grid=(1,),                                                    # collapsed S-grid
        in_specs=[spec2(x.shape), spec2(w_in.shape), spec2(w_z.shape),
                  spec2(w_att.shape), spec2(w_out.shape), spec2(biases.shape)],
        out_specs=spec2((M, OUT_PAD)),
        compiler_params=pltpu.CompilerParams(dimension_semantics=("arbitrary",)),
    )(x, w_in, w_z, w_att, w_out, biases)

    logits = out_wide[:, :TAG_SIZE].reshape(S, B, TAG_SIZE)
    return jnp.transpose(logits, (1, 0, 2))                           # (B, S, TAG_SIZE)


def nll_loss_from_probs(probs, labels, ignore_index=IGNORE_INDEX):
    # matches F.nll_loss(log(softmax(probs).clamp(1e-9)).transpose(1,2), labels)
    sm = jax.nn.softmax(probs, axis=-1)
    logp = jnp.log(jnp.clip(sm, 1e-9))
    valid = (labels != ignore_index)
    safe = jnp.where(valid, labels, 0)
    picked = jnp.take_along_axis(logp, safe[..., None], axis=-1)[..., 0]
    return -jnp.sum(picked * valid) / jnp.maximum(jnp.sum(valid), 1)


def enhanced_cell_forward(feats, lengths, labels, params):
    probs = enhanced_cell_probs_pallas(feats, lengths, labels, params)
    return nll_loss_from_probs(probs, labels), probs


# ---------------- pure-JAX reference (for sanity check) ----------------
def reference_probs(feats, lengths, labels, p):
    B, S, D = feats.shape
    true_embs = build_true_embs(labels, p['emb'])
    feats_pad = padding_feats(feats, lengths, p['pad_bng'], p['pad_end'])
    relu = lambda v: jnp.maximum(v, 0.0)
    outs = []
    for s in range(S):
        fs = s + NUM_PRE_TOKENS
        pred_e = true_embs[:, s:s + NUM_PRE_PREDS, :].reshape(B, -1)
        f_prev = feats_pad[:, fs - NUM_PRE_TOKENS:fs, :].reshape(B, -1)
        f_cur = feats_pad[:, fs, :]
        f_nxt = feats_pad[:, fs + 1:fs + 1 + NUM_NXT_TOKENS, :].reshape(B, -1)
        hy = relu(pred_e @ p['w_hy'] + p['b_hy'])
        hf = relu(f_prev @ p['w_hf'] + p['b_hf'])
        hc = relu(f_cur @ p['w_hc'] + p['b_hc'])
        hl = relu(f_nxt @ p['w_hl'] + p['b_hl'])
        att = jax.nn.softmax(hy @ p['wa_y'] + hc @ p['wa_c'] + p['b_a'], axis=-1)
        hs = (hy, hf, hc, hl)
        hidden = jnp.zeros_like(hy)
        for g in range(4):
            zg = jax.nn.sigmoid(hy @ p['wz_y'][g] + hc @ p['wz_c'][g] + p['bz'][g])
            hidden = hidden + hs[g] * zg * att[:, g:g + 1]
        outs.append(hidden @ p['w_out'] + p['b_out'])
    return jnp.stack(outs, axis=1)


# ---------------- deterministic parameter init ----------------
def init_params(key):
    ks = jax.random.split(key, 24)
    u = lambda k, shape, s=0.1: jax.random.uniform(k, shape, jnp.float32, -s, s)
    return dict(
        emb=u(ks[0], (TAG_SIZE + NUM_PRE_PREDS, EMB)),
        pad_bng=u(ks[1], (1, 1, IN_HIDDEN)),
        pad_end=u(ks[2], (1, 1, IN_HIDDEN)),
        w_hy=u(ks[3], (NUM_PRE_PREDS * EMB, HIDDEN)), b_hy=u(ks[4], (1, HIDDEN)),
        w_hf=u(ks[5], (NUM_PRE_TOKENS * IN_HIDDEN, HIDDEN)), b_hf=u(ks[6], (1, HIDDEN)),
        w_hc=u(ks[7], (IN_HIDDEN, HIDDEN)), b_hc=u(ks[8], (1, HIDDEN)),
        w_hl=u(ks[9], (NUM_NXT_TOKENS * IN_HIDDEN, HIDDEN)), b_hl=u(ks[10], (1, HIDDEN)),
        # decay gates stacked in order [Z_hy, Z_hf, Z_hc, Z_hl]; the 2H input
        # weight is split into its hy-part and hc-part (no concat needed).
        wz_y=u(ks[11], (4, HIDDEN, HIDDEN)),
        wz_c=u(ks[12], (4, HIDDEN, HIDDEN)),
        bz=u(ks[13], (4, 1, HIDDEN)),
        wa_y=u(ks[14], (HIDDEN, 4)), wa_c=u(ks[15], (HIDDEN, 4)), b_a=u(ks[16], (1, 4)),
        w_out=u(ks[17], (HIDDEN, TAG_SIZE)), b_out=u(ks[18], (1, TAG_SIZE)),
    )


if __name__ == "__main__":
    key = jax.random.PRNGKey(0)
    k_feat, k_lab, k_par = jax.random.split(key, 3)

    feats = jax.random.normal(k_feat, (BATCH, SEQ, IN_HIDDEN), jnp.float32)
    labels = jax.random.randint(k_lab, (BATCH, SEQ), 0, TAG_SIZE, jnp.int32)
    lengths = jnp.array([SEQ, SEQ - 3], dtype=jnp.int32)
    params = init_params(k_par)

    loss, probs = jax.jit(enhanced_cell_forward)(feats, lengths, labels, params)
    jax.block_until_ready((loss, probs))

    ref_p = reference_probs(feats, lengths, labels, params)
    ref_loss = nll_loss_from_probs(ref_p, labels)
    assert jnp.allclose(probs, ref_p, atol=5e-3, rtol=5e-3), "probs mismatch"
    assert jnp.allclose(loss, ref_loss, atol=5e-3, rtol=5e-3), "loss mismatch"

    print("KERNEL_OK")
</pallas_src>

<mosaic_0001>
module attributes {stable_mosaic.version = 11 : i64} {
  func.func @enhanced_cell_kernel(%arg0: i32, %arg1: memref<16x192xf32, #tpu.memory_space<vmem>>, %arg2: memref<192x128xbf16, #tpu.memory_space<vmem>>, %arg3: memref<128x128xbf16, #tpu.memory_space<vmem>>, %arg4: memref<128x128xbf16, #tpu.memory_space<vmem>>, %arg5: memref<128x128xbf16, #tpu.memory_space<vmem>>, %arg6: memref<4x128xf32, #tpu.memory_space<vmem>>, %arg7: memref<16x128xf32, #tpu.memory_space<vmem>>) attributes {dimension_semantics = [#tpu.dimension_semantics<arbitrary>], iteration_bounds = array<i64: 1>, scalar_prefetch = 0 : i64, scratch_operands = 0 : i64, tpu.core_type = #tpu.core_type<tc>, window_params = [{pipeline_mode = #tpu.pipeline_mode<synchronous>, transform_indices = @transform_0, window_bounds = array<i64: 16, 192>}, {pipeline_mode = #tpu.pipeline_mode<synchronous>, transform_indices = @transform_1, window_bounds = array<i64: 192, 128>}, {pipeline_mode = #tpu.pipeline_mode<synchronous>, transform_indices = @transform_2, window_bounds = array<i64: 128, 128>}, {pipeline_mode = #tpu.pipeline_mode<synchronous>, transform_indices = @transform_3, window_bounds = array<i64: 128, 128>}, {pipeline_mode = #tpu.pipeline_mode<synchronous>, transform_indices = @transform_4, window_bounds = array<i64: 128, 128>}, {pipeline_mode = #tpu.pipeline_mode<synchronous>, transform_indices = @transform_5, window_bounds = array<i64: 4, 128>}, {pipeline_mode = #tpu.pipeline_mode<synchronous>, transform_indices = @transform_6, window_bounds = array<i64: 16, 128>}]} {
    %c0 = arith.constant 0 : index
    %c0_0 = arith.constant 0 : index
    %0 = vector.load %arg6[%c0, %c0_0] : memref<4x128xf32, #tpu.memory_space<vmem>>, vector<4x128xf32>
    %c0_1 = arith.constant 0 : index
    %c0_2 = arith.constant 0 : index
    %1 = vector.load %arg1[%c0_1, %c0_2] : memref<16x192xf32, #tpu.memory_space<vmem>>, vector<16x192xf32>
    %2 = arith.truncf %1 : vector<16x192xf32> to vector<16x192xbf16>
    %c0_3 = arith.constant 0 : index
    %c0_4 = arith.constant 0 : index
    %3 = vector.load %arg2[%c0_3, %c0_4] : memref<192x128xbf16, #tpu.memory_space<vmem>>, vector<192x128xbf16>
    %cst = arith.constant dense<0.000000e+00> : vector<16x128xf32>
    %4 = tpu.matmul %2, %3, %cst {dimension_numbers = #tpu.dot_dimension_numbers<[1], [0], [0], [1], [0, 0, 1, 1], [], []>} : vector<16x192xbf16>, vector<192x128xbf16>, vector<16x128xf32> -> vector<16x128xf32>
    %5 = vector.extract_strided_slice %0 {offsets = [0, 0], sizes = [1, 128], strides = [1, 1]} : vector<4x128xf32> to vector<1x128xf32>
    %6 = vector.broadcast %5 : vector<1x128xf32> to vector<16x128xf32>
    %7 = arith.addf %4, %6 : vector<16x128xf32>
    %cst_5 = arith.constant 0.000000e+00 : f32
    %8 = vector.broadcast %cst_5 : f32 to vector<16x128xf32>
    %9 = arith.maximumf %7, %8 : vector<16x128xf32>
    %10 = arith.truncf %9 : vector<16x128xf32> to vector<16x128xbf16>
    %c0_6 = arith.constant 0 : index
    %c0_7 = arith.constant 0 : index
    %11 = vector.load %arg3[%c0_6, %c0_7] : memref<128x128xbf16, #tpu.memory_space<vmem>>, vector<128x128xbf16>
    %cst_8 = arith.constant dense<0.000000e+00> : vector<16x128xf32>
    %12 = tpu.matmul %10, %11, %cst_8 {dimension_numbers = #tpu.dot_dimension_numbers<[1], [0], [0], [1], [0, 0, 1, 1], [], []>} : vector<16x128xbf16>, vector<128x128xbf16>, vector<16x128xf32> -> vector<16x128xf32>
    %13 = vector.extract_strided_slice %0 {offsets = [1, 0], sizes = [1, 128], strides = [1, 1]} : vector<4x128xf32> to vector<1x128xf32>
    %14 = vector.broadcast %13 : vector<1x128xf32> to vector<16x128xf32>
    %15 = arith.addf %12, %14 : vector<16x128xf32>
    %16 = arith.negf %15 : vector<16x128xf32>
    %17 = math.exp %16 : vector<16x128xf32>
    %cst_9 = arith.constant 1.000000e+00 : f32
    %18 = vector.broadcast %cst_9 : f32 to vector<16x128xf32>
    %19 = arith.addf %18, %17 : vector<16x128xf32>
    %20 = arith.divf %18, %19 : vector<16x128xf32>
    %c0_10 = arith.constant 0 : index
    %c0_11 = arith.constant 0 : index
    %21 = vector.load %arg4[%c0_10, %c0_11] : memref<128x128xbf16, #tpu.memory_space<vmem>>, vector<128x128xbf16>
    %cst_12 = arith.constant dense<0.000000e+00> : vector<16x128xf32>
    %22 = tpu.matmul %10, %21, %cst_12 {dimension_numbers = #tpu.dot_dimension_numbers<[1], [0], [0], [1], [0, 0, 1, 1], [], []>} : vector<16x128xbf16>, vector<128x128xbf16>, vector<16x128xf32> -> vector<16x128xf32>
    %23 = vector.extract_strided_slice %0 {offsets = [2, 0], sizes = [1, 128], strides = [1, 1]} : vector<4x128xf32> to vector<1x128xf32>
    %24 = vector.broadcast %23 : vector<1x128xf32> to vector<16x128xf32>
    %25 = arith.addf %22, %24 : vector<16x128xf32>
    %cst_13 = arith.constant dense<0xFF800000> : vector<16xf32>
    %26 = vector.multi_reduction <maximumf>, %25, %cst_13 [1] : vector<16x128xf32> to vector<16xf32>
    %27 = vector.shape_cast %26 : vector<16xf32> to vector<16x1xf32>
    %28 = vector.broadcast %27 : vector<16x1xf32> to vector<16x128xf32>
    %29 = arith.subf %25, %28 : vector<16x128xf32>
    %30 = math.exp %29 : vector<16x128xf32>
    %cst_14 = arith.constant dense<0.000000e+00> : vector<16xf32>
    %31 = vector.multi_reduction <add>, %30, %cst_14 [1] : vector<16x128xf32> to vector<16xf32>
    %32 = vector.shape_cast %31 : vector<16xf32> to vector<16x1xf32>
    %cst_15 = arith.constant 3.125000e-02 : f32
    %33 = vector.broadcast %cst_15 : f32 to vector<16x1xf32>
    %34 = arith.mulf %32, %33 : vector<16x1xf32>
    %35 = tpu.reciprocal %34 {approx = true} : vector<16x1xf32> -> vector<16x1xf32>
    %36 = vector.broadcast %35 : vector<16x1xf32> to vector<16x128xf32>
    %37 = arith.mulf %30, %36 : vector<16x128xf32>
    %38 = arith.mulf %9, %20 : vector<16x128xf32>
    %39 = arith.mulf %38, %37 : vector<16x128xf32>
    %40 = arith.truncf %39 : vector<16x128xf32> to vector<16x128xbf16>
    %c0_16 = arith.constant 0 : index
    %c0_17 = arith.constant 0 : index
    %41 = vector.load %arg5[%c0_16, %c0_17] : memref<128x128xbf16, #tpu.memory_space<vmem>>, vector<128x128xbf16>
    %cst_18 = arith.constant dense<0.000000e+00> : vector<16x128xf32>
    %42 = tpu.matmul %40, %41, %cst_18 {dimension_numbers = #tpu.dot_dimension_numbers<[1], [0], [0], [1], [0, 0, 1, 1], [], []>} : vector<16x128xbf16>, vector<128x128xbf16>, vector<16x128xf32> -> vector<16x128xf32>
    %43 = vector.extract_strided_slice %0 {offsets = [3, 0], sizes = [1, 128], strides = [1, 1]} : vector<4x128xf32> to vector<1x128xf32>
    %44 = vector.broadcast %43 : vector<1x128xf32> to vector<16x128xf32>
    %45 = arith.addf %42, %44 : vector<16x128xf32>
    %c0_19 = arith.constant 0 : index
    %c0_20 = arith.constant 0 : index
    %46 = vector.load %arg7[%c0_19, %c0_20] : memref<16x128xf32, #tpu.memory_space<vmem>>, vector<16x128xf32>
    tpu.vector_store %arg7[%c0_19, %c0_20], %45 {strides = array<i32>} : memref<16x128xf32, #tpu.memory_space<vmem>>, vector<16x128xf32>,
    return
  }
  func.func @transform_0(%arg0: i32) -> (i32, i32) {
    %c0_i32 = arith.constant 0 : i32
    %c0_i32_0 = arith.constant 0 : i32
    %c0_i32_1 = arith.constant 0 : i32
    return %c0_i32, %c0_i32_0 : i32, i32
  }
  func.func @transform_1(%arg0: i32) -> (i32, i32) {
    %c0_i32 = arith.constant 0 : i32
    %c0_i32_0 = arith.constant 0 : i32
    %c0_i32_1 = arith.constant 0 : i32
    return %c0_i32, %c0_i32_0 : i32, i32
  }
  func.func @transform_2(%arg0: i32) -> (i32, i32) {
    %c0_i32 = arith.constant 0 : i32
    %c0_i32_0 = arith.constant 0 : i32
    %c0_i32_1 = arith.constant 0 : i32
    return %c0_i32, %c0_i32_0 : i32, i32
  }
  func.func @transform_3(%arg0: i32) -> (i32, i32) {
    %c0_i32 = arith.constant 0 : i32
    %c0_i32_0 = arith.constant 0 : i32
    %c0_i32_1 = arith.constant 0 : i32
    return %c0_i32, %c0_i32_0 : i32, i32
  }
  func.func @transform_4(%arg0: i32) -> (i32, i32) {
    %c0_i32 = arith.constant 0 : i32
    %c0_i32_0 = arith.constant 0 : i32
    %c0_i32_1 = arith.constant 0 : i32
    return %c0_i32, %c0_i32_0 : i32, i32
  }
  func.func @transform_5(%arg0: i32) -> (i32, i32) {
    %c0_i32 = arith.constant 0 : i32
    %c0_i32_0 = arith.constant 0 : i32
    %c0_i32_1 = arith.constant 0 : i32
    return %c0_i32, %c0_i32_0 : i32, i32
  }
  func.func @transform_6(%arg0: i32) -> (i32, i32) {
    %c0_i32 = arith.constant 0 : i32
    %c0_i32_0 = arith.constant 0 : i32
    %c0_i32_1 = arith.constant 0 : i32
    return %c0_i32, %c0_i32_0 : i32, i32
  }
}

</mosaic_0001>

<bundles_post_ra>
// kernel: enhanced_cell_forward.1
= control target key start
LH: loop header
LB: loop body
LE: loop exit
PB: predicated region body
PF: predicated region fallthrough
CT: control target
= control target key end

     0   :  { %v730_v0 = vmov 0   ;;  %v731_v2 = vmov 0.0   ;;  %vm131_vm0 = vcmask 523264   ;;  %vm732_vm1 = vmmov 0   ;;  %s965_s1 = inlined_call_operand.vmem [shape: bf16[192,128], index: 1, kind: input, shape index: {}]   ;;  %s966_s0 = inlined_call_operand.vmem [shape: f32[16,192], index: 0, kind: input, shape index: {}]   ;;  %s967_s2 = inlined_call_operand.vmem [shape: bf16[128,128], index: 2, kind: input, shape index: {}]   ;;  %s968_s3 = inlined_call_operand.vmem [shape: bf16[128,128], index: 3, kind: input, shape index: {}]   ;;  %s969_s5 = inlined_call_operand.vmem [shape: f32[4,128], index: 5, kind: input, shape index: {}]   ;;  %s970_s4 = inlined_call_operand.vmem [shape: bf16[128,128], index: 4, kind: input, shape index: {}]   ;;  %s971_s6 = inlined_call_operand.vmem [shape: f32[16,128], index: 6, kind: output, shape index: {}]  }
   0x1   :  { %135 = vmatprep.subr.bf16.mxu0 %v730_v0  ;;  %v678_v1 = vld [vmem:[%s965_s1 + $0x38] sm:$0xff]   ;;  %615 = vmatprep.subr.bf16.mxu1 %v731_v2  ;;  %v679_v3 = vld [vmem:[%s965_s1 + $0x30] sm:$0xff]   ;;  %v680_v4 = vld [vmem:[%s965_s1 + $0x28] sm:$0xff]   ;;  %v55_v28 = vlaneseq }
   0x2   :  { %136 = vmatpush1.bf16.msra.mxu0 %v678_v1  ;;  %v681_v5 = vld [vmem:[%s965_s1 + $0x20] sm:$0xff]   ;;  %v26_v6 = vld [vmem:[%s966_s0 + $0x8] sm:$0xff]  ;;  %v28_v7 = vld [vmem:[%s966_s0 + $0x18] sm:$0xff]  ;;  %631 = vmatprep.mubr.msk.bf16.mxu1 %vm732_vm1, %v731_v2 }
   0x3   :  { %137 = vmatprep.subr.bf16.mxu0 %v730_v0  ;;  %v682_v8 = vld [vmem:[%s965_s1 + $0x18] sm:$0xff]   ;;  %v30_v9 = vpack.c.bf16 %v28_v7, %v26_v6  ;;  %v691_v11 = vld [vmem:[%s967_s2 + $0x30] sm:$0xff]   ;;  %v692_v13 = vld [vmem:[%s967_s2 + $0x28] sm:$0xff]   ;;  %v866_v29 = vshrl.u32 %v55_v28, 7 }
   0x4   :  { %v690_v10 = vld [vmem:[%s967_s2 + $0x38] sm:$0xff]   ;;  %v683_v12 = vld [vmem:[%s965_s1 + $0x10] sm:$0xff]   ;;  %v684_v14 = vld [vmem:[%s965_s1 + $0x8] sm:$0xff]  }
   0x5   :  { %561 = vmatprep.mubr.msk.bf16.mxu0 %vm131_vm0, %v30_v9  ;;  %616 = vmatpush3.bf16.msra.mxu1 %v690_v10  ;;  %v693_v15 = vld [vmem:[%s967_s2 + $0x20] sm:$0xff]   ;;  %v694_v17 = vld [vmem:[%s967_s2 + $0x18] sm:$0xff]   ;;  %v695_v19 = vld [vmem:[%s967_s2 + $0x10] sm:$0xff]   ;;  %v57_v30 = vsub.s32 0, %v866_v29  ;;  %v318_v54 = vsub.s32 2, %v866_v29 }
   0x6   :  { %138 = vmatpush1.bf16.msra.mxu0 %v679_v3  ;;  %617 = vmatprep.subr.bf16.mxu1 %v731_v2  ;;  %v685_v16 = vld [vmem:[%s965_s1] sm:$0xff]   ;;  %v686_v18 = vld [vmem:[%s965_s1 + $0x58] sm:$0xff]   ;;  %v687_v20 = vld [vmem:[%s965_s1 + $0x50] sm:$0xff]  }
   0x7   :  { %139 = vmatprep.subr.bf16.mxu0 %v730_v0  ;;  %v688_v21 = vld [vmem:[%s965_s1 + $0x48] sm:$0xff]   ;;  %v689_v22 = vld [vmem:[%s965_s1 + $0x40] sm:$0xff]   ;;  %v27_v24 = vld [vmem:[%s966_s0 + $0x10] sm:$0xff] }
   0x8   :  { %v25_v23 = vld [vmem:[%s966_s0] sm:$0xff]  ;;  %v696_v26 = vld [vmem:[%s967_s2 + $0x8] sm:$0xff]   ;;  %v698_v41 = vld [vmem:[%s968_s3 + $0x38] sm:$0xff]  }
   0x9   :  { %618 = vmatpush3.bf16.msra.mxu1 %v691_v11  ;;  %v29_v25 = vpack.c.bf16 %v27_v24, %v25_v23  ;;  %v697_v27 = vld [vmem:[%s967_s2] sm:$0xff]   ;;  %v699_v43 = vld [vmem:[%s968_s3 + $0x30] sm:$0xff]   ;;  %v700_v44 = vld [vmem:[%s968_s3 + $0x28] sm:$0xff]  }
   0xa   :  { %140 = vmatpush1.bf16.msra.mxu0 %v680_v4  ;;  %619 = vmatprep.subr.bf16.mxu1 %v731_v2  ;;  %v872_v31 = vld [vmem:[%s969_s5] sm:$0xf]  ;;  %v702_v46 = vld [vmem:[%s968_s3 + $0x18] sm:$0xff]   ;;  %v703_v47 = vld [vmem:[%s968_s3 + $0x10] sm:$0xff]  }
   0xb   :  { %141 = vmatprep.subr.bf16.mxu0 %v730_v0  ;;  %v58_v32 = vrot.slane %v872_v31, %v57_v30  ;;  %v701_v45 = vld [vmem:[%s968_s3 + $0x20] sm:$0xff]   ;;  %v704_v48 = vld [vmem:[%s968_s3 + $0x8] sm:$0xff]   ;;  %v319_v55 = vrot.slane %v872_v31, %v318_v54  ;;  %v706_v62 = vld [vmem:[%s970_s4 + $0x38] sm:$0xff]  }
   0xc   :  { %v705_v49 = vld [vmem:[%s968_s3] sm:$0xff]   ;;  %v707_v63 = vld [vmem:[%s970_s4 + $0x30] sm:$0xff]   ;;  %v708_v9 = vld [vmem:[%s970_s4 + $0x28] sm:$0xff]  }
   0xd   :  { %620 = vmatpush3.bf16.msra.mxu1 %v692_v13  ;;  %v709_v10 = vld [vmem:[%s970_s4 + $0x20] sm:$0xff]   ;;  %v710_v11 = vld [vmem:[%s970_s4 + $0x18] sm:$0xff]   ;;  %v712_v13 = vld [vmem:[%s970_s4 + $0x8] sm:$0xff]  }
   0xe   :  { %142 = vmatpush1.bf16.msra.mxu0 %v681_v5  ;;  %621 = vmatprep.subr.bf16.mxu1 %v731_v2 }
   0xf   :  { %143 = vmatprep.subr.bf16.mxu0 %v730_v0 }
  0x11   :  { %622 = vmatpush3.bf16.msra.mxu1 %v693_v15  ;;  %v197_v15 = vsub.s32 1, %v866_v29 }
  0x12   :  { %144 = vmatpush1.bf16.msra.mxu0 %v682_v8  ;;  %623 = vmatprep.subr.bf16.mxu1 %v731_v2 }
  0x13   :  { %145 = vmatprep.subr.bf16.mxu0 %v730_v0 }
  0x15   :  { %624 = vmatpush3.bf16.msra.mxu1 %v694_v17 }
  0x16   :  { %146 = vmatpush1.bf16.msra.mxu0 %v683_v12  ;;  %625 = vmatprep.subr.bf16.mxu1 %v731_v2  ;;  %v711_v12 = vld [vmem:[%s970_s4 + $0x10] sm:$0xff]  }
  0x17   :  { %147 = vmatprep.subr.bf16.mxu0 %v730_v0 }
  0x19   :  { %626 = vmatpush3.bf16.msra.mxu1 %v695_v19 }
  0x1a   :  { %148 = vmatpush1.bf16.msra.mxu0 %v684_v14  ;;  %627 = vmatprep.subr.bf16.mxu1 %v731_v2  ;;  %v713_v14 = vld [vmem:[%s970_s4] sm:$0xff]  }
  0x1b   :  { %149 = vmatprep.subr.bf16.mxu0 %v730_v0 }
  0x1d   :  { %628 = vmatpush3.bf16.msra.mxu1 %v696_v26 }
  0x1e   :  { %150 = vmatpush1.bf16.msra.mxu0 %v685_v16  ;;  %629 = vmatprep.subr.bf16.mxu1 %v731_v2  ;;  %v198_v16 = vrot.slane %v872_v31, %v197_v15 }
  0x1f   :  { %159 = vmatprep.subr.bf16.mxu0 %v730_v0 }
  0x21   :  { %630 = vmatpush3.bf16.msra.mxu1 %v697_v27 }
  0x22   :  { %160 = vmatpush2.bf16.msra.mxu0 %v686_v18  ;;  %635 = vmatprep.subr.bf16.mxu1 %v731_v2 }
  0x23   :  { %161 = vmatprep.subr.bf16.mxu0 %v730_v0 }
  0x26   :  { %162 = vmatpush2.bf16.msra.mxu0 %v687_v20 }
  0x27   :  { %163 = vmatprep.subr.bf16.mxu0 %v730_v0 }
  0x2a   :  { %164 = vmatpush2.bf16.msra.mxu0 %v688_v21 }
  0x2b   :  { %165 = vmatprep.subr.bf16.mxu0 %v730_v0 }
  0x2e   :  { %166 = vmatpush2.bf16.msra.mxu0 %v689_v22 }
  0x2f   :  { %655 = vmatprep.subr.bf16.mxu0 %v731_v2 }
  0x31   :  { %168 = vmatmul.mubr.bf16.vlgmr.msra.gmra.mxu0 %v29_v25 }
  0x32   :  { %671 = vmatprep.mubr.msk.bf16.mxu0 %vm732_vm1, %v731_v2  ;;  %656 = vmatpush3.bf16.msra.mxu0 %v706_v62 }
  0x33   :  { %657 = vmatprep.subr.bf16.mxu0 %v731_v2 }
  0x36   :  { %658 = vmatpush3.bf16.msra.mxu0 %v707_v63 }
  0x37   :  { %659 = vmatprep.subr.bf16.mxu0 %v731_v2 }
  0x3a   :  { %660 = vmatpush3.bf16.msra.mxu0 %v708_v9 }
  0x3b   :  { %661 = vmatprep.subr.bf16.mxu0 %v731_v2 }
  0x3e   :  { %662 = vmatpush3.bf16.msra.mxu0 %v709_v10 }
  0x3f   :  { %663 = vmatprep.subr.bf16.mxu0 %v731_v2 }
  0x42   :  { %664 = vmatpush3.bf16.msra.mxu0 %v710_v11 }
  0x43   :  { %665 = vmatprep.subr.bf16.mxu0 %v731_v2 }
  0x46   :  { %666 = vmatpush3.bf16.msra.mxu0 %v711_v12 }
  0x47   :  { %667 = vmatprep.subr.bf16.mxu0 %v731_v2 }
  0x4a   :  { %668 = vmatpush3.bf16.msra.mxu0 %v712_v13 }
  0x4b   :  { %669 = vmatprep.subr.bf16.mxu0 %v731_v2 }
  0x4e   :  { %670 = vmatpush3.bf16.msra.mxu0 %v713_v14 }
  0xf1   :  { %v169_v33 = vpop.f32.mrf.mxu0 }
  0xf2   :  { %v875_v35 = vadd.f32 %v169_v33, %v58_v32 }
  0xf3   :  { %v171_v34 = vpop.f32.mrf.mxu0 }
  0xf4   :  { %v176_v39 = vmax.f32 %v875_v35, 0.0 }
  0xf5   :  { %v172_v36 = vpop.f32.mrf.mxu0 }
  0xf6   :  { %v877_v37 = vadd.f32 %v172_v36, %v58_v32 }
  0xf7   :  { %v174_v38 = vpop.f32.mrf.mxu0 }
  0xf8   :  { %v177_v40 = vmax.f32 %v877_v37, 0.0 }
  0xfa   :  { %v178_v42 = vpack.c.bf16 %v177_v40, %v176_v39 }
  0xfc   :  { %632 = vmatmul.mubr.bf16.vlgmr.msra.gmra.mxu1 %v178_v42 }
  0xfd   :  { %636 = vmatpush3.bf16.msra.mxu1 %v698_v41  ;;  %651 = vmatprep.mubr.msk.bf16.mxu1 %vm732_vm1, %v731_v2 }
  0xfe   :  { %637 = vmatprep.subr.bf16.mxu1 %v731_v2 }
 0x101   :  { %638 = vmatpush3.bf16.msra.mxu1 %v699_v43 }
 0x102   :  { %639 = vmatprep.subr.bf16.mxu1 %v731_v2 }
 0x105   :  { %640 = vmatpush3.bf16.msra.mxu1 %v700_v44 }
 0x106   :  { %641 = vmatprep.subr.bf16.mxu1 %v731_v2 }
 0x109   :  { %642 = vmatpush3.bf16.msra.mxu1 %v701_v45  ;;  %v452_v45 = vsub.s32 3, %v866_v29 }
 0x10a   :  { %643 = vmatprep.subr.bf16.mxu1 %v731_v2 }
 0x10d   :  { %644 = vmatpush3.bf16.msra.mxu1 %v702_v46  ;;  %v453_v46 = vrot.slane %v872_v31, %v452_v45 }
 0x10e   :  { %645 = vmatprep.subr.bf16.mxu1 %v731_v2 }
 0x111   :  { %646 = vmatpush3.bf16.msra.mxu1 %v703_v47 }
 0x112   :  { %647 = vmatprep.subr.bf16.mxu1 %v731_v2 }
 0x115   :  { %648 = vmatpush3.bf16.msra.mxu1 %v704_v48 }
 0x116   :  { %649 = vmatprep.subr.bf16.mxu1 %v731_v2 }
 0x119   :  { %650 = vmatpush3.bf16.msra.mxu1 %v705_v49 }
 0x11c   :  { %652 = vmatmul.mubr.bf16.vlgmr.msra.gmra.mxu1 %v178_v42 }
 0x1bc   :  { %v281_v50 = vpop.f32.mrf.mxu1 }
 0x1bd   :  { %v282_v17 = vadd.f32 %v281_v50, %v198_v16 }
 0x1be   :  { %v633_v51 = vpop.f32.mrf.mxu1 }
 0x1bf   :  { %v570_v19 = vmul.f32 -1.442695, %v282_v17 }
 0x1c0   :  { %v284_v52 = vpop.f32.mrf.mxu1 }
 0x1c1   :  { %v285_v18 = vadd.f32 %v284_v52, %v198_v16 }
 0x1c2   :  { %v634_v53 = vpop.f32.mrf.mxu1 }
 0x1c3   :  { %v571_v20 = vmul.f32 -1.442695, %v285_v18 }
 0x1dc   :  { %v402_v56 = vpop.f32.mrf.mxu1 }
 0x1dd   :  { %v403_v57 = vadd.f32 %v402_v56, %v319_v55 }
 0x1de   :  { %v653_v58 = vpop.f32.mrf.mxu1 }
 0x1df   :  { %409 = vmax.xlane.f32.xlu0 %v403_v57 }
 0x1e0   :  { %v405_v59 = vpop.f32.mrf.mxu1 }
 0x1e1   :  { %v406_v60 = vadd.f32 %v405_v59, %v319_v55 }
 0x1e2   :  { %v654_v61 = vpop.f32.mrf.mxu1 }
 0x1e3   :  { %411 = vmax.xlane.f32.xlu0 %v406_v60 }
 0x268   :  { %v410_v0 = vpop.xlane.xlu0 %409 }
 0x269   :  { %v413_v1 = vsub.f32 %v403_v57, %v410_v0 }
 0x26b   :  { %v415_v3 = vmul.f32 1.442695, %v413_v1 }
 0x26c   :  { %v412_v4 = vpop.xlane.xlu0 %411 }
 0x26d   :  { %714 = vpow2.f32 %v415_v3  ;;  %v414_v5 = vsub.f32 %v406_v60, %v412_v4 }
 0x26f   :  { %v417_v6 = vmul.f32 1.442695, %v414_v5 }
 0x271   :  { %716 = vpow2.f32 %v417_v6 }
 0x272   :  { %718 = vpow2.f32 %v570_v19 }
 0x273   :  { %720 = vpow2.f32 %v571_v20 }
 0x27a   :  { %v715_v7 = vpop.eup %714 }
 0x27b   :  { %419 = vadd.xlane.f32.xlu1 %v715_v7 }
 0x27e   :  { %v717_v8 = vpop.eup %716 }
 0x27f   :  { %421 = vadd.xlane.f32.xlu1 %v717_v8  ;;  %v719_v21 = vpop.eup %718 }
 0x280   :  { %v721_v22 = vpop.eup %720  ;;  %v294_v23 = vadd.f32 1.0, %v719_v21 }
 0x281   :  { %v295_v25 = vadd.f32 1.0, %v721_v22 }
 0x304   :  { %v420_v24 = vpop.xlane.xlu1 %419 }
 0x305   :  { %v423_v26 = vmul.f32 0.03125, %v420_v24 }
 0x307   :  { %722 = vrcp.f32 %v423_v26 }
 0x308   :  { %724 = vrcp.f32 %v294_v23  ;;  %v422_v2 = vpop.xlane.xlu1 %421 }
 0x309   :  { %726 = vrcp.f32 %v295_v25  ;;  %v424_v27 = vmul.f32 0.03125, %v422_v2 }
 0x30b   :  { %728 = vrcp.f32 %v424_v27 }
 0x314   :  { %v723_v28 = vpop.eup %722 }
 0x315   :  { %v725_v30 = vpop.eup %724  ;;  %v427_v33 = vmul.f32 %v723_v28, %v715_v7 }
 0x316   :  { %v727_v32 = vpop.eup %726  ;;  %v429_v38 = vmul.f32 %v725_v30, %v176_v39 }
 0x317   :  { %v430_v41 = vmul.f32 %v727_v32, %v177_v40 }
 0x318   :  { %v729_v34 = vpop.eup %728  ;;  %v431_v42 = vmul.f32 %v429_v38, %v427_v33 }
 0x319   :  { %v428_v36 = vmul.f32 %v729_v34, %v717_v8 }
 0x31b   :  { %v432_v43 = vmul.f32 %v430_v41, %v428_v36 }
 0x31d   :  { %v433_v44 = vpack.c.bf16 %v432_v43, %v431_v42 }
 0x31f   :  { %672 = vmatmul.mubr.bf16.vlgmr.msra.gmra.mxu0 %v433_v44 }
 0x3df   :  { %v536_v47 = vpop.f32.mrf.mxu0 }
 0x3e0   :  { %v537_v48 = vadd.f32 %v536_v47, %v453_v46 }
 0x3e1   :  { %v673_v49 = vpop.f32.mrf.mxu0 }
 0x3e2   :  { %543 = vst [vmem:[%s971_s6] sm:$0xff] %v537_v48 }
 0x3e3   :  { %v539_v35 = vpop.f32.mrf.mxu0 }
 0x3e4   :  { %v540_v39 = vadd.f32 %v539_v35, %v453_v46 }
 0x3e5   :  { %v674_v50 = vpop.f32.mrf.mxu0 }
 0x3e6   :  { %544 = vst [vmem:[%s971_s6 + $0x8] sm:$0xff] %v540_v39 }

</bundles_post_ra>
